<compile_context>
chip_gen: v7x
topology: tpu7x:2x2x1
jax: 0.10.0
libtpu: 0.0.40
codegen_flags: <defaults>
</compile_context>

<pallas_src>
import jax
import jax.numpy as jnp
from jax.experimental import pallas as pl
from jax.experimental.pallas import tpu as pltpu


def _embed_kernel(ids_ref, table_ref, out_ref):
    # ids_ref:   (1, BLOCK_ROWS) int32, lane-major block of atomic numbers
    # table_ref: (num_atoms, atom_dim) embedding table, resident in VMEM
    # out_ref:   (BLOCK_ROWS, atom_dim) output block
    ids = ids_ref[...]                                   # (1, TM) int32
    tm = out_ref.shape[0]
    num_atoms = table_ref.shape[0]

    # Transposed one-hot: onehot_t[a, m] = (a == ids[m]).
    # ids stay lane-major; the (1, TM) row broadcasts along sublanes (cheap),
    # so no lane<->sublane relayout of the ids is needed.
    atom_iota = jax.lax.broadcasted_iota(jnp.int32, (num_atoms, tm), dimension=0)
    onehot_t = (atom_iota == ids).astype(table_ref.dtype)  # (num_atoms, TM)

    # out[m, d] = sum_a onehot_t[a, m] * table[a, d]   (transposed-LHS matmul;
    # MXU cost is ~100x under the output DMA, so shape inefficiency is hidden).
    acc = jax.lax.dot_general(
        onehot_t, table_ref[...],
        dimension_numbers=(((0,), (0,)), ((), ())),
        preferred_element_type=jnp.float32,
    )
    out_ref[...] = acc.astype(out_ref.dtype)             # single cast at the store


def atom_embedding(atomic_numbers: jnp.ndarray,
                   emb_table: jnp.ndarray,
                   *,
                   block_rows: int = 1024) -> jnp.ndarray:
    """Equivalent of nn.Embedding(num_atoms, atom_dim, padding_idx=0)(atomic_numbers).

    padding_idx=0 semantics are carried by the table itself (row 0 is zero).
    """
    orig_shape = atomic_numbers.shape
    ids = atomic_numbers.reshape(-1).astype(jnp.int32)
    n = ids.shape[0]
    num_atoms, atom_dim = emb_table.shape
    itemsize = emb_table.dtype.itemsize

    # Shrink the block for tiny inputs (single full-extent block, sublane
    # aligned); otherwise require lane alignment so blocks tile cleanly.
    block_rows = int(block_rows)
    n_rounded = ((n + 7) // 8) * 8
    if block_rows >= n_rounded:
        block_rows = n_rounded
    else:
        assert block_rows % 128 == 0, "block_rows must be a multiple of 128"

    n_blocks = pl.cdiv(n, block_rows)
    n_padded = n_blocks * block_rows
    if n_padded != n:
        # Pad ids only (4 B/row, negligible); padded ids are 0 -> zero rows
        # that land past `n` and are discarded by the masked output store.
        ids = jnp.pad(ids, (0, n_padded - n))
    ids_row = ids.reshape(1, n_padded)   # lane-major: avoids 128x lane padding in VMEM

    out = pl.pallas_call(
        _embed_kernel,
        # Unpadded output: no wrapper-side slice copy; Pallas masks the ragged
        # last block's writeback.
        out_shape=jax.ShapeDtypeStruct((n, atom_dim), emb_table.dtype),
        grid=(n_blocks,),
        in_specs=[
            # Lane-major block of ids for this grid step (contiguous DMA).
            pl.BlockSpec((1, block_rows), lambda i: (0, i)),
            # Whole table, constant index_map -> DMA'd to VMEM once, reused.
            pl.BlockSpec((num_atoms, atom_dim), lambda i: (0, 0)),
        ],
        out_specs=pl.BlockSpec((block_rows, atom_dim), lambda i: (i, 0)),
        compiler_params=pltpu.CompilerParams(
            dimension_semantics=("parallel",),
            vmem_limit_bytes=32 * 1024 * 1024,
        ),
        cost_estimate=pl.CostEstimate(
            flops=2 * n_padded * num_atoms * atom_dim,
            transcendentals=0,
            bytes_accessed=(
                n_padded * 4                       # ids
                + num_atoms * atom_dim * itemsize  # table (read once)
                + n * atom_dim * itemsize          # output
            ),
        ),
    )(ids_row, emb_table)

    return out.reshape(*orig_shape, atom_dim)


def make_embedding_table(num_atoms: int, atom_dim: int, key) -> jnp.ndarray:
    # Deterministic init matching nn.Embedding: N(0, 1), padding row (idx 0) zeroed.
    table = jax.random.normal(key, (num_atoms, atom_dim), dtype=jnp.float32)
    table = table.at[0].set(0.0)
    return table


if __name__ == "__main__":
    num_atoms = 32
    atom_dim = 128  # lane-aligned embedding width

    key = jax.random.PRNGKey(0)
    k_table, k_ids = jax.random.split(key)

    emb_table = make_embedding_table(num_atoms, atom_dim, k_table)

    # atomic numbers: batch of 2 molecules x 8 atoms each, including padding (0)
    atomic_numbers = jax.random.randint(k_ids, (2, 8), minval=0, maxval=num_atoms)

    out = atom_embedding(atomic_numbers, emb_table)
    out = jax.block_until_ready(out)

    # Reference: plain JAX gather. Tolerance covers the MXU's reduced-precision
    # f32 matmul modes (default precision) while remaining far tighter than the
    # O(1) separation between distinct N(0,1) table rows, so wrong-row gathers
    # are still caught.
    ref = jnp.take(emb_table, atomic_numbers, axis=0)
    assert out.shape == (2, 8, atom_dim), out.shape
    assert jnp.allclose(out, ref, rtol=2e-2, atol=2e-2), "mismatch vs reference embedding lookup"
    # padding_idx=0 rows must be exactly zero (1.0 * 0.0 accumulates exactly).
    assert bool(jnp.all(jnp.where(atomic_numbers[..., None] == 0, out == 0.0, True)))

    print("KERNEL_OK")
</pallas_src>

<mosaic_0001>
module attributes {stable_mosaic.version = 11 : i64} {
  func.func @_embed_kernel(%arg0: i32, %arg1: memref<1x16xi32, #tpu.memory_space<vmem>>, %arg2: memref<32x128xf32, #tpu.memory_space<vmem>>, %arg3: memref<16x128xf32, #tpu.memory_space<vmem>>) attributes {dimension_semantics = [#tpu.dimension_semantics<parallel>], iteration_bounds = array<i64: 1>, scalar_prefetch = 0 : i64, scratch_operands = 0 : i64, tpu.core_type = #tpu.core_type<tc>, window_params = [{transform_indices = @transform_0, window_bounds = array<i64: 1, 16>}, {pipeline_mode = #tpu.pipeline_mode<synchronous>, transform_indices = @transform_1, window_bounds = array<i64: 32, 128>}, {transform_indices = @transform_2, window_bounds = array<i64: 16, 128>}]} {
    %c0 = arith.constant 0 : index
    %c0_0 = arith.constant 0 : index
    %0 = vector.load %arg1[%c0, %c0_0] : memref<1x16xi32, #tpu.memory_space<vmem>>, vector<1x16xi32>
    %1 = tpu.iota {dimensions = array<i32: 0>} : vector<32x16xi32>
    %2 = vector.broadcast %0 : vector<1x16xi32> to vector<32x16xi32>
    %3 = arith.cmpi eq, %1, %2 : vector<32x16xi32>
    %4 = arith.extui %3 : vector<32x16xi1> to vector<32x16xi32>
    %5 = arith.sitofp %4 : vector<32x16xi32> to vector<32x16xf32>
    %c0_1 = arith.constant 0 : index
    %c0_2 = arith.constant 0 : index
    %6 = vector.load %arg2[%c0_1, %c0_2] : memref<32x128xf32, #tpu.memory_space<vmem>>, vector<32x128xf32>
    %cst = arith.constant dense<0.000000e+00> : vector<16x128xf32>
    %7 = tpu.matmul %5, %6, %cst {dimension_numbers = #tpu.dot_dimension_numbers<[0], [0], [1], [1], [0, 1, 1, 1], [], []>} : vector<32x16xf32>, vector<32x128xf32>, vector<16x128xf32> -> vector<16x128xf32>
    %c0_3 = arith.constant 0 : index
    %c0_4 = arith.constant 0 : index
    %8 = vector.load %arg3[%c0_3, %c0_4] : memref<16x128xf32, #tpu.memory_space<vmem>>, vector<16x128xf32>
    tpu.vector_store %arg3[%c0_3, %c0_4], %7 {strides = array<i32>} : memref<16x128xf32, #tpu.memory_space<vmem>>, vector<16x128xf32>,
    return
  }
  func.func @transform_0(%arg0: i32) -> (i32, i32) {
    %c0_i32 = arith.constant 0 : i32
    %c0_i32_0 = arith.constant 0 : i32
    return %c0_i32, %arg0 : i32, i32
  }
  func.func @transform_1(%arg0: i32) -> (i32, i32) {
    %c0_i32 = arith.constant 0 : i32
    %c0_i32_0 = arith.constant 0 : i32
    %c0_i32_1 = arith.constant 0 : i32
    return %c0_i32, %c0_i32_0 : i32, i32
  }
  func.func @transform_2(%arg0: i32) -> (i32, i32) {
    %c0_i32 = arith.constant 0 : i32
    %c0_i32_0 = arith.constant 0 : i32
    return %arg0, %c0_i32 : i32, i32
  }
}

</mosaic_0001>

<bundles_post_ra>
// kernel: tpu_custom_call.1
= control target key start
LH: loop header
LB: loop body
LE: loop exit
PB: predicated region body
PF: predicated region fallthrough
CT: control target
= control target key end

     0   :  { %7 = vsyncpa [#allocation3], 0  ;;  %s378_s0 = inlined_call_operand.hbm [shape: s32[1,16], index: 0, kind: input, shape index: {}]   ;;  %s379_s1 = inlined_call_operand.hbm [shape: f32[32,128], index: 1, kind: input, shape index: {}]   ;;  %s380_s2 = inlined_call_operand.hbm [shape: f32[16,128], index: 2, kind: output, shape index: {}]  }
   0x1   :  { %8 = vsyncpa [#allocation6], 0 }
   0x2   :  { %9 = vsyncpa [#allocation4], 0  ;;  %s308_s9 = smov [#allocation2]   ;;  %s309_s11 = smov [#allocation5]  }
   0x3   :  { %s16_s10 = sshll.u32 %s308_s9, 4  ;;  %s25_s12 = sshll.u32 %s309_s11, 4  ;;  %s17_s10 = int_to_ptr.vmem [resolvable:$true] %s16_s10  ;;  %s329_s12 = int_to_ptr.vmem [resolvable:$true] %s25_s12 }
   0x4   :  { %s236_s15 = scalar_lea.hbm %s378_s0, 16 }
   0x5   :  { %p237_p0 = scmp.ne.s32.totalorder %s378_s0, %s236_s15  ;;  %p240_p1 = scmp.lt.u32.totalorder %s236_s15, %s378_s0 }
   0x7   :  { %p242_p2 = pnand %p240_p1, %p237_p0 }
   0x9   :  { %245 = shalt.err (!%p242_p2)
}
   0xa   :  { %s246_s20 = scalar_lea.vmem %s17_s10, 16  ;;  %s250_s21 = scalar_lea.vmem %s17_s10, 32 }
   0xb   :  { %p247_p3 = scmp.ne.s32.totalorder %s17_s10, %s246_s20  ;;  %p251_p4 = scmp.lt.s32.totalorder %s17_s10, %s17_s10 }
   0xc   :  { %p252_p5 = scmp.lt.s32.totalorder %s250_s21, %s246_s20 }
   0xe   :  { %p253_p6 = por %p252_p5, %p251_p4 }
  0x10   :  { %p254_p7 = pnand %p253_p6, %p247_p3 }
  0x12   :  { %257 = shalt.err (!%p254_p7)
}
  0x13   :  { %19 = dma.hbm_to_vmem [thread:$0]  %s378_s0, 16, %s17_s10, [#allocation3]  }
  0x14   :  { %s258_s26 = scalar_lea.hbm %s379_s1, 512 }
  0x15   :  { %p259_p8 = scmp.ne.s32.totalorder %s379_s1, %s258_s26  ;;  %p262_p9 = scmp.lt.u32.totalorder %s258_s26, %s379_s1 }
  0x17   :  { %p264_p10 = pnand %p262_p9, %p259_p8 }
  0x19   :  { %267 = shalt.err (!%p264_p10)
}
  0x1a   :  { %s268_s3 = scalar_lea.vmem %s329_s12, 512  ;;  %p273_p12 = scmp.lt.s32.totalorder %s329_s12, %s329_s12 }
  0x1b   :  { %p269_p11 = scmp.ne.s32.totalorder %s329_s12, %s268_s3  ;;  %p274_p13 = scmp.lt.s32.totalorder %s268_s3, %s268_s3 }
  0x1d   :  { %p275_p0 = por %p274_p13, %p273_p12 }
  0x1f   :  { %p276_p1 = pnand %p275_p0, %p269_p11 }
  0x21   :  { %279 = shalt.err (!%p276_p1)
}
  0x22   :  { %s310_s0 = smov 128   ;;  %s311_s4 = smov 8  }
  0x23   :  { %31 = dma.hbm_to_vmem [thread:$0]  %s379_s1, 512, %s329_s12, [#allocation6], %s310_s0, %s310_s0, %s311_s4  }
  0x24   :  { %302 = dma.done.wait [#allocation3], 16  }
  0x25   :  { %303 = vsyncadd [#allocation3], 4294967280 }
  0x26   :  { %304 = dma.done.wait [#allocation6], 512  }
  0x27   :  { %305 = vsyncadd [#allocation6], 4294966784  ;;  %v39_v0 = vlaneseq  ;;  %v198_v3 = vld [vmem:[#allocation2] ss:$0 sm:$0xff]  ;;  %v60_v4 = vld [vmem:[#allocation5] sm:$0xff]  ;;  %v312_v9 = vmov 0.0  }
  0x28   :  { %v61_v5 = vld [vmem:[#allocation5 + $0x8] sm:$0xff]  ;;  %v62_v7 = vld [vmem:[#allocation5 + $0x10] sm:$0xff]  ;;  %v63_v8 = vld [vmem:[#allocation5 + $0x18] sm:$0xff]  ;;  %vm96_vm4 = vcmask 261120   ;;  %s313_s1 = smov [#allocation7]  }
  0x29   :  { %v40_v1 = vshrl.u32 %v39_v0, 7  ;;  %v222_v11 = vpack.c.bf16 %v61_v5, %v60_v4  ;;  %v226_v12 = vpack.c.bf16 %v63_v8, %v62_v7  ;;  %s185_s7 = sshll.u32 %s313_s1, 4  ;;  %s186_s7 = int_to_ptr.vmem [resolvable:$true] %s185_s7 }
  0x2a   :  { %s280_s8 = scalar_lea.vmem %s186_s7, 256  ;;  %p285_p3 = scmp.lt.s32.totalorder %s186_s7, %s186_s7 }
  0x2b   :  { %v41_v2 = vadd.s32 8, %v40_v1  ;;  %vm48_vm0 = vcmp.eq.s32.totalorder %v40_v1, %v198_v3  ;;  %v42_v6 = vadd.s32 16, %v40_v1  ;;  %v43_v14 = vadd.s32 24, %v40_v1  ;;  %223 = vmatprep.subr.bf16.mxu0 %v222_v11  ;;  %p281_p2 = scmp.ne.s32.totalorder %s186_s7, %s280_s8  ;;  %p286_p4 = scmp.lt.s32.totalorder %s280_s8, %s280_s8 }
  0x2c   :  { %v199_v10 = vsel %vm48_vm0, 1.0, %v312_v9  ;;  %225 = vmatpush3.bf16.msra.mxu0 %v222_v11 }
  0x2d   :  { %vm49_vm1 = vcmp.eq.s32.totalorder %v41_v2, %v198_v3  ;;  %64 = vxpose.xlu0.b32.start [1/4] (short) (narrow) %v199_v10, 16  ;;  %vm50_vm2 = vcmp.eq.s32.totalorder %v42_v6, %v198_v3  ;;  %227 = vmatprep.subr.bf16.mxu0 %v226_v12  ;;  %vm51_vm3 = vcmp.eq.s32.totalorder %v43_v14, %v198_v3  ;;  %p287_p5 = por %p286_p4, %p285_p3 }
  0x2e   :  { %v200_v13 = vsel %vm49_vm1, 1.0, %v312_v9  ;;  %v201_v15 = vsel %vm50_vm2, 1.0, %v312_v9  ;;  %v202_v16 = vsel %vm51_vm3, 1.0, %v312_v9 }
  0x2f   :  { %p288_p6 = pnand %p287_p5, %p281_p2 }
  0x30   :  { %229 = vmatpush3.bf16.msra.mxu0 %v226_v12 }
  0x31   :  { %65 = vxpose.xlu0.b32.cont [2/4] (short) (narrow) %v200_v13, 16 }
  0x35   :  { %66 = vxpose.xlu0.b32.cont [3/4] (short) (narrow) %v201_v15, 16 }
  0x39   :  { %67 = vxpose.xlu0.b32.end [4/4] (short) (narrow) %v202_v16, 16 }
  0xad   :  { %v80_v17 = vpop.trf.xlu0 }
  0xae   :  { %219 = vmatprep.mubr.msk.f32.mxu0 %vm96_vm4, %v80_v17 }
  0xb1   :  { %v81_v18 = vpop.trf.xlu0 }
  0xb2   :  { %220 = vmatmul.mubr.msk.f32.vlgmr.msra.gmra.mrb[0].mxu0 %vm96_vm4, %v81_v18 }
 0x185   :  { %v221_v19 = vpop.f32.mrb[0].mxu0 }
 0x186   :  { %179 = vst [vmem:[#allocation7 + $0x8] sm:$0xff] %v221_v19  ;;  %v169_v20 = vpop.f32.mrb[1].mxu0 }
 0x187   :  { %178 = vst [vmem:[#allocation7] sm:$0xff] %v169_v20 }
 0x188   :  { %291 = shalt.err (!%p288_p6)
}
 0x189   :  { %s292_s11 = scalar_lea.hbm %s380_s2, 256 }
 0x18a   :  { %p293_p7 = scmp.ne.s32.totalorder %s380_s2, %s292_s11  ;;  %p296_p8 = scmp.lt.u32.totalorder %s292_s11, %s380_s2 }
 0x18c   :  { %p298_p9 = pnand %p296_p8, %p293_p7 }
 0x18e   :  { %301 = shalt.err (!%p298_p9)
}
 0x18f   :  { %191 = dma.vmem_to_hbm [thread:$0]  %s186_s7, 256, %s380_s2, [#allocation4], %s310_s0, %s310_s0, %s311_s4  }
 0x190   :  { %306 = dma.done.wait [#allocation4], 256  }
 0x191   :  { %307 = vsyncadd [#allocation4], 4294967040 }
 0x192   :  { %195 = vsyncpa [#allocation3], 1 }
 0x193   :  { %196 = vsyncpa [#allocation6], 1 }
 0x194   :  { %197 = vsyncpa [#allocation4], 1 }

</bundles_post_ra>
